<compile_context>
chip_gen: v6e
topology: v6e:2x2x1
jax: 0.10.0
libtpu: 0.0.40
codegen_flags: <defaults>
</compile_context>

<pallas_src>
import math
import functools

import jax
import jax.numpy as jnp
from jax import lax
from jax.experimental import pallas as pl
from jax.experimental.pallas import tpu as pltpu


_MASK_NONE, _MASK_EXPLICIT, _MASK_CAUSAL = 0, 1, 2


def _pick_head_block(h, d_k, d_v):
    """Pick the number of heads per grid step.

    Prefer the smallest divisor of h that gives a lane-dense value width
    (HB*d_v >= 128) with 128-aligned q/k column groups (HB*d_k % 128 == 0);
    fall back to any divisor reaching 128 lanes, else block all heads.
    """
    for cand in range(1, h + 1):
        if h % cand == 0 and cand * d_v >= 128 and (cand * d_k) % 128 == 0:
            return cand
    for cand in range(1, h + 1):
        if h % cand == 0 and cand * d_v >= 128:
            return cand
    return h


def fuse_mha_params(params, *, h, d_k, d_v, head_block=None):
    """One-time repack of nn.Linear-style weights into fused per-head-group blocks.

    Hoisted out of the per-forward path (perf review item): call once when the
    parameters are loaded, reuse the result for every forward call.
    Layout per group: columns are [all-q | all-k | all-v].
    """
    d_model = params["wq"].shape[1]
    hb = head_block or _pick_head_block(h, d_k, d_v)
    assert h % hb == 0
    hg = h // hb

    def w_grp(w, d):
        # nn.Linear weight is (out, in) with out features head-major:
        # (h*d, d_model) -> (HG, HB*d, d_model) -> (HG, d_model, HB*d)
        return w.reshape(hg, hb * d, d_model).transpose(0, 2, 1)

    def b_grp(b, d):
        return b.reshape(hg, 1, hb * d)

    wqkv = jnp.concatenate(
        [w_grp(params["wq"], d_k), w_grp(params["wk"], d_k),
         w_grp(params["wv"], d_v)], axis=-1).astype(jnp.bfloat16)   # (HG, d_model, HB*F)
    bqkv = jnp.concatenate(
        [b_grp(params["bq"], d_k), b_grp(params["bk"], d_k),
         b_grp(params["bv"], d_v)], axis=-1).astype(jnp.float32)    # (HG, 1, HB*F)
    return {"wqkv": wqkv, "bqkv": bqkv, "h": h, "d_k": d_k, "d_v": d_v,
            "head_block": hb}


def _mha_group_kernel(x_ref, w_ref, b_ref, *rest, head_block, d_k, d_v, scale,
                      mask_mode):
    if mask_mode == _MASK_EXPLICIT:
        mask_ref, o_ref = rest
    else:
        (o_ref,) = rest

    x = x_ref[0]                       # (C, d_model)     bf16
    w = w_ref[0]                       # (d_model, HB*F)  bf16, [all-q|all-k|all-v]
    b = b_ref[0]                       # (1, HB*F)        f32
    C = x.shape[0]
    qw = head_block * d_k              # lane width of the q (and k) column group

    # Fused q|k|v projection for the whole head group: one wide MXU matmul
    # (bf16 operands, f32 accumulate), bias added once.
    qkv = jnp.dot(x, w, preferred_element_type=jnp.float32) + b    # (C, HB*F) f32
    q_all = qkv[:, :qw] * scale        # scale q once (C*HB*d_k muls, not (C,C))
    k_all = qkv[:, qw:2 * qw]
    v_all = qkv[:, 2 * qw:]

    if mask_mode == _MASK_EXPLICIT:
        add_mask = mask_ref[0].astype(jnp.float32)                 # (C, C)
    elif mask_mode == _MASK_CAUSAL:
        # Generated in-kernel: no mask DMA, no mask VMEM residency.
        row = lax.broadcasted_iota(jnp.int32, (C, C), 0)
        col = lax.broadcasted_iota(jnp.int32, (C, C), 1)
        add_mask = jnp.where(col > row, -jnp.inf, 0.0).astype(jnp.float32)
    else:
        add_mask = None

    for hb in range(head_block):       # static unroll over heads in the block
        q = q_all[:, hb * d_k:(hb + 1) * d_k].astype(jnp.bfloat16)
        k = k_all[:, hb * d_k:(hb + 1) * d_k].astype(jnp.bfloat16)
        v = v_all[:, hb * d_v:(hb + 1) * d_v].astype(jnp.bfloat16)

        # Scores: NT matmul (contract last dims of both operands) -- no k.T.
        s = lax.dot_general(q, k, (((1,), (1,)), ((), ())),
                            preferred_element_type=jnp.float32)    # (C, C) f32
        if add_mask is not None:
            s = s + add_mask

        # Softmax with deferred normalization; exponent in bf16 (EUP relief on
        # v6e/v7x; p is already MXU-ready), row sums accumulated in f32.
        m = jnp.max(s, axis=-1, keepdims=True)
        p = jnp.exp((s - m).astype(jnp.bfloat16))                  # (C, C) bf16
        denom = jnp.sum(p.astype(jnp.float32), axis=-1, keepdims=True)

        o = jnp.dot(p, v, preferred_element_type=jnp.float32)      # (C, d_v) f32
        o_ref[0, hb] = (o * pl.reciprocal(denom, approx=True)).astype(o_ref.dtype)


def multi_headed_attention(x, mask, fused, *, causal=False):
    """x: (B, C, d_model); mask: None, (C, C) or (B, C, C) additive (0 / -inf).

    `fused` comes from fuse_mha_params().  If causal=True the mask argument is
    ignored and a causal mask is generated inside the kernel.
    """
    B, C, d_model = x.shape
    h, d_k, d_v = fused["h"], fused["d_k"], fused["d_v"]
    hb = fused["head_block"]
    hg = h // hb
    F = 2 * d_k + d_v

    if causal:
        mask_mode = _MASK_CAUSAL
    elif mask is not None:
        mask_mode = _MASK_EXPLICIT
    else:
        mask_mode = _MASK_NONE

    x_bf16 = x.astype(jnp.bfloat16)

    # Grid order by DMA traffic: keep the larger grid-invariant operand on the
    # inner axis so Pallas keeps it resident (skips redundant DMAs).
    weights_resident = (hb * F) > C
    if weights_resident:
        grid = (hg, B)
        x_map = lambda g, b: (b, 0, 0)
        w_map = lambda g, b: (g, 0, 0)
        bias_map = lambda g, b: (g, 0, 0)
        o_map = lambda g, b: (b, g, 0, 0)
        m_shared_map = lambda g, b: (0, 0, 0)
        m_batch_map = lambda g, b: (b, 0, 0)
    else:
        grid = (B, hg)
        x_map = lambda b, g: (b, 0, 0)
        w_map = lambda b, g: (g, 0, 0)
        bias_map = lambda b, g: (g, 0, 0)
        o_map = lambda b, g: (b, g, 0, 0)
        m_shared_map = lambda b, g: (0, 0, 0)
        m_batch_map = lambda b, g: (b, 0, 0)

    in_specs = [
        pl.BlockSpec((1, C, d_model), x_map),        # x
        pl.BlockSpec((1, d_model, hb * F), w_map),   # fused per-group weights
        pl.BlockSpec((1, 1, hb * F), bias_map),      # fused per-group biases
    ]
    inputs = [x_bf16, fused["wqkv"], fused["bqkv"]]

    if mask_mode == _MASK_EXPLICIT:
        if mask.ndim == 2:
            mask3 = mask.reshape(1, C, C).astype(jnp.bfloat16)   # shared, bf16
            in_specs.append(pl.BlockSpec((1, C, C), m_shared_map))
        else:
            mask3 = mask.astype(jnp.bfloat16)                    # per-batch, bf16
            in_specs.append(pl.BlockSpec((1, C, C), m_batch_map))
        inputs.append(mask3)

    kernel = functools.partial(
        _mha_group_kernel, head_block=hb, d_k=d_k, d_v=d_v,
        scale=1.0 / math.sqrt(d_k), mask_mode=mask_mode)

    # Hardware-aware VMEM limit: rough working-set estimate, clamped to 85% of
    # the chip's per-core VMEM capacity (fits v7x's 64 MiB as well).
    try:
        info = pltpu.get_tpu_info()
    except Exception:
        info = None
    vmem_cap = getattr(info, "vmem_capacity_bytes", None) or (64 * 1024 * 1024)
    blocks = 2 * (C * d_model * 2 + d_model * hb * F * 2 + hb * F * 4
                  + hb * C * d_v * 4)
    if mask_mode == _MASK_EXPLICIT:
        blocks += 2 * C * C * 2
    temps = C * hb * F * 4 + C * C * (4 + 4 + 2) + C * d_v * 4
    vmem_limit = int(min(0.85 * vmem_cap,
                         max(32 * 1024 * 1024, 2 * (blocks + temps))))

    out_bhcd = pl.pallas_call(
        kernel,
        out_shape=jax.ShapeDtypeStruct((B, h, C, d_v), x.dtype),
        grid_spec=pltpu.PrefetchScalarGridSpec(
            num_scalar_prefetch=0,
            grid=grid,
            in_specs=in_specs,
            out_specs=pl.BlockSpec((1, hb, C, d_v), o_map),
        ),
        compiler_params=pltpu.CompilerParams(
            dimension_semantics=("parallel", "parallel"),
            vmem_limit_bytes=vmem_limit),
    )(*inputs)

    # torch: result.view(B, C, d_model) on the contiguous (B, h, C, d_v) tensor
    # -- a raw row-major reshape, no head/context transpose (faithful to the
    # module, even though it interleaves heads and positions).
    return out_bhcd.reshape(B, C, h * d_v)


def _reference(x, mask, params, *, h, d_k, d_v):
    """Pure-JAX (f32) mirror of the PyTorch forward, for a sanity check."""
    B, C, D = x.shape
    q = x @ params["wq"].T + params["bq"]
    k = x @ params["wk"].T + params["bk"]
    v = x @ params["wv"].T + params["bv"]
    q = q.reshape(B, C, h, d_k).transpose(0, 2, 1, 3)
    k = k.reshape(B, C, h, d_k).transpose(0, 2, 1, 3)
    v = v.reshape(B, C, h, d_v).transpose(0, 2, 1, 3)
    scores = jnp.einsum("bhqd,bhkd->bhqk", q, k) / math.sqrt(d_k)
    if mask is not None:
        m = mask if mask.ndim == 3 else jnp.broadcast_to(mask, (B, C, C))
        scores = scores + m[:, None, :, :]
    p = jax.nn.softmax(scores, axis=-1)
    res = jnp.einsum("bhqk,bhkd->bhqd", p, v)       # (B, h, C, d_v)
    return res.reshape(B, C, h * d_v)               # raw view, no transpose (as in torch)


if __name__ == "__main__":
    # Small deterministic configuration (d_model = h * d_k = h * d_v, as required
    # by the module's final `.view(B, C, d_model)`).
    B, C, d_model, h = 2, 8, 32, 4
    d_k = d_model // h
    d_v = d_k

    key = jax.random.PRNGKey(0)
    kx, kwq, kbq, kwk, kbk, kwv, kbv = jax.random.split(key, 7)

    x = jax.random.normal(kx, (B, C, d_model), dtype=jnp.float32)

    # nn.Linear-style init (uniform in [-1/sqrt(in), 1/sqrt(in)]), deterministic.
    lim = 1.0 / math.sqrt(d_model)
    params = {
        "wq": jax.random.uniform(kwq, (h * d_k, d_model), jnp.float32, -lim, lim),
        "bq": jax.random.uniform(kbq, (h * d_k,), jnp.float32, -lim, lim),
        "wk": jax.random.uniform(kwk, (h * d_k, d_model), jnp.float32, -lim, lim),
        "bk": jax.random.uniform(kbk, (h * d_k,), jnp.float32, -lim, lim),
        "wv": jax.random.uniform(kwv, (h * d_v, d_model), jnp.float32, -lim, lim),
        "bv": jax.random.uniform(kbv, (h * d_v,), jnp.float32, -lim, lim),
    }

    # One-time weight fusion (hoisted out of the forward path).
    fused = fuse_mha_params(params, h=h, d_k=d_k, d_v=d_v)

    # Shared causal mask (C, C): -inf above the diagonal, 0 elsewhere.
    row = jnp.arange(C)[:, None]
    col = jnp.arange(C)[None, :]
    mask = jnp.where(col > row, -jnp.inf, 0.0).astype(jnp.float32)

    ref = _reference(x, mask, params, h=h, d_k=d_k, d_v=d_v)

    # 1) explicit mask path (mask DMA'd as bf16).
    out = multi_headed_attention(x, mask, fused)
    out = jax.block_until_ready(out)
    assert out.shape == (B, C, d_model)
    # bf16 MXU operands + bf16 exp + approx reciprocal => relaxed tolerance.
    assert jnp.allclose(out, ref, atol=5e-2, rtol=5e-2), "mismatch (explicit mask)"

    # 2) in-kernel causal mask path (no mask DMA at all).
    out_c = multi_headed_attention(x, None, fused, causal=True)
    out_c = jax.block_until_ready(out_c)
    assert jnp.allclose(out_c, ref, atol=5e-2, rtol=5e-2), "mismatch (causal in-kernel)"

    # 3) mask=None path (no mask add).
    out_nm = multi_headed_attention(x, None, fused)
    out_nm = jax.block_until_ready(out_nm)
    ref_nm = _reference(x, None, params, h=h, d_k=d_k, d_v=d_v)
    assert jnp.allclose(out_nm, ref_nm, atol=5e-2, rtol=5e-2), "mismatch (no mask)"

    print("KERNEL_OK")
</pallas_src>

<mosaic_0001>
module attributes {stable_mosaic.version = 11 : i64} {
  func.func @_mha_group_kernel(%arg0: i32, %arg1: i32, %arg2: memref<1x8x32xbf16, #tpu.memory_space<vmem>>, %arg3: memref<1x32x96xbf16, #tpu.memory_space<vmem>>, %arg4: memref<1x1x96xf32, #tpu.memory_space<vmem>>, %arg5: memref<1x8x8xbf16, #tpu.memory_space<vmem>>, %arg6: memref<1x4x8x8xf32, #tpu.memory_space<vmem>>) attributes {dimension_semantics = [#tpu.dimension_semantics<parallel>, #tpu.dimension_semantics<parallel>], iteration_bounds = array<i64: 1, 2>, scalar_prefetch = 0 : i64, scratch_operands = 0 : i64, tpu.core_type = #tpu.core_type<tc>, window_params = [{transform_indices = @transform_0, window_bounds = array<i64: 1, 8, 32>}, {transform_indices = @transform_1, window_bounds = array<i64: 1, 32, 96>}, {transform_indices = @transform_2, window_bounds = array<i64: 1, 1, 96>}, {pipeline_mode = #tpu.pipeline_mode<synchronous>, transform_indices = @transform_3, window_bounds = array<i64: 1, 8, 8>}, {transform_indices = @transform_4, window_bounds = array<i64: 1, 4, 8, 8>}]} {
    %c0 = arith.constant 0 : index
    %c0_0 = arith.constant 0 : index
    %c0_1 = arith.constant 0 : index
    %0 = vector.load %arg2[%c0, %c0_0, %c0_1] : memref<1x8x32xbf16, #tpu.memory_space<vmem>>, vector<1x8x32xbf16>
    %1 = vector.shape_cast %0 : vector<1x8x32xbf16> to vector<8x32xbf16>
    %c0_2 = arith.constant 0 : index
    %c0_3 = arith.constant 0 : index
    %c0_4 = arith.constant 0 : index
    %2 = vector.load %arg3[%c0_2, %c0_3, %c0_4] : memref<1x32x96xbf16, #tpu.memory_space<vmem>>, vector<1x32x96xbf16>
    %3 = vector.shape_cast %2 : vector<1x32x96xbf16> to vector<32x96xbf16>
    %c0_5 = arith.constant 0 : index
    %c0_6 = arith.constant 0 : index
    %c0_7 = arith.constant 0 : index
    %4 = vector.load %arg4[%c0_5, %c0_6, %c0_7] : memref<1x1x96xf32, #tpu.memory_space<vmem>>, vector<1x1x96xf32>
    %5 = vector.shape_cast %4 : vector<1x1x96xf32> to vector<1x96xf32>
    %cst = arith.constant dense<0.000000e+00> : vector<8x96xf32>
    %6 = tpu.matmul %1, %3, %cst {dimension_numbers = #tpu.dot_dimension_numbers<[1], [0], [0], [1], [0, 0, 1, 1], [], []>} : vector<8x32xbf16>, vector<32x96xbf16>, vector<8x96xf32> -> vector<8x96xf32>
    %7 = vector.broadcast %5 : vector<1x96xf32> to vector<8x96xf32>
    %8 = arith.addf %6, %7 : vector<8x96xf32>
    %9 = vector.extract_strided_slice %8 {offsets = [0, 0], sizes = [8, 32], strides = [1, 1]} : vector<8x96xf32> to vector<8x32xf32>
    %cst_8 = arith.constant 0.353553385 : f32
    %10 = vector.broadcast %cst_8 : f32 to vector<8x32xf32>
    %11 = arith.mulf %9, %10 : vector<8x32xf32>
    %12 = vector.extract_strided_slice %8 {offsets = [0, 32], sizes = [8, 32], strides = [1, 1]} : vector<8x96xf32> to vector<8x32xf32>
    %13 = vector.extract_strided_slice %8 {offsets = [0, 64], sizes = [8, 32], strides = [1, 1]} : vector<8x96xf32> to vector<8x32xf32>
    %c0_9 = arith.constant 0 : index
    %c0_10 = arith.constant 0 : index
    %c0_11 = arith.constant 0 : index
    %14 = vector.load %arg5[%c0_9, %c0_10, %c0_11] : memref<1x8x8xbf16, #tpu.memory_space<vmem>>, vector<1x8x8xbf16>
    %15 = vector.shape_cast %14 : vector<1x8x8xbf16> to vector<8x8xbf16>
    %16 = arith.extf %15 : vector<8x8xbf16> to vector<8x8xf32>
    %17 = vector.extract_strided_slice %11 {offsets = [0, 0], sizes = [8, 8], strides = [1, 1]} : vector<8x32xf32> to vector<8x8xf32>
    %18 = arith.truncf %17 : vector<8x8xf32> to vector<8x8xbf16>
    %19 = vector.extract_strided_slice %12 {offsets = [0, 0], sizes = [8, 8], strides = [1, 1]} : vector<8x32xf32> to vector<8x8xf32>
    %20 = arith.truncf %19 : vector<8x8xf32> to vector<8x8xbf16>
    %21 = vector.extract_strided_slice %13 {offsets = [0, 0], sizes = [8, 8], strides = [1, 1]} : vector<8x32xf32> to vector<8x8xf32>
    %22 = arith.truncf %21 : vector<8x8xf32> to vector<8x8xbf16>
    %cst_12 = arith.constant dense<0.000000e+00> : vector<8x8xf32>
    %23 = tpu.matmul %18, %20, %cst_12 {dimension_numbers = #tpu.dot_dimension_numbers<[1], [1], [0], [0], [0, 0, 1, 0], [], []>} : vector<8x8xbf16>, vector<8x8xbf16>, vector<8x8xf32> -> vector<8x8xf32>
    %24 = arith.addf %23, %16 : vector<8x8xf32>
    %cst_13 = arith.constant dense<0xFF800000> : vector<8xf32>
    %25 = vector.multi_reduction <maximumf>, %24, %cst_13 [1] : vector<8x8xf32> to vector<8xf32>
    %26 = vector.shape_cast %25 : vector<8xf32> to vector<8x1xf32>
    %27 = vector.broadcast %26 : vector<8x1xf32> to vector<8x8xf32>
    %28 = arith.subf %24, %27 : vector<8x8xf32>
    %29 = arith.truncf %28 : vector<8x8xf32> to vector<8x8xbf16>
    %30 = math.exp %29 : vector<8x8xbf16>
    %31 = arith.extf %30 : vector<8x8xbf16> to vector<8x8xf32>
    %cst_14 = arith.constant dense<0.000000e+00> : vector<8xf32>
    %32 = vector.multi_reduction <add>, %31, %cst_14 [1] : vector<8x8xf32> to vector<8xf32>
    %33 = vector.shape_cast %32 : vector<8xf32> to vector<8x1xf32>
    %cst_15 = arith.constant dense<0.000000e+00> : vector<8x8xf32>
    %34 = tpu.matmul %30, %22, %cst_15 {dimension_numbers = #tpu.dot_dimension_numbers<[1], [0], [0], [1], [0, 0, 1, 1], [], []>} : vector<8x8xbf16>, vector<8x8xbf16>, vector<8x8xf32> -> vector<8x8xf32>
    %35 = tpu.reciprocal %33 {approx = true} : vector<8x1xf32> -> vector<8x1xf32>
    %36 = vector.broadcast %35 : vector<8x1xf32> to vector<8x8xf32>
    %37 = arith.mulf %34, %36 : vector<8x8xf32>
    %c0_16 = arith.constant 0 : index
    %c0_17 = arith.constant 0 : index
    %c0_18 = arith.constant 0 : index
    %c0_19 = arith.constant 0 : index
    %38 = vector.load %arg6[%c0_16, %c0_17, %c0_18, %c0_19] : memref<1x4x8x8xf32, #tpu.memory_space<vmem>>, vector<1x1x8x8xf32>
    %39 = vector.shape_cast %38 : vector<1x1x8x8xf32> to vector<8x8xf32>
    %40 = vector.shape_cast %37 : vector<8x8xf32> to vector<1x1x8x8xf32>
    tpu.vector_store %arg6[%c0_16, %c0_17, %c0_18, %c0_19], %40 {strides = array<i32>} : memref<1x4x8x8xf32, #tpu.memory_space<vmem>>, vector<1x1x8x8xf32>,
    %41 = vector.extract_strided_slice %11 {offsets = [0, 8], sizes = [8, 8], strides = [1, 1]} : vector<8x32xf32> to vector<8x8xf32>
    %42 = arith.truncf %41 : vector<8x8xf32> to vector<8x8xbf16>
    %43 = vector.extract_strided_slice %12 {offsets = [0, 8], sizes = [8, 8], strides = [1, 1]} : vector<8x32xf32> to vector<8x8xf32>
    %44 = arith.truncf %43 : vector<8x8xf32> to vector<8x8xbf16>
    %45 = vector.extract_strided_slice %13 {offsets = [0, 8], sizes = [8, 8], strides = [1, 1]} : vector<8x32xf32> to vector<8x8xf32>
    %46 = arith.truncf %45 : vector<8x8xf32> to vector<8x8xbf16>
    %cst_20 = arith.constant dense<0.000000e+00> : vector<8x8xf32>
    %47 = tpu.matmul %42, %44, %cst_20 {dimension_numbers = #tpu.dot_dimension_numbers<[1], [1], [0], [0], [0, 0, 1, 0], [], []>} : vector<8x8xbf16>, vector<8x8xbf16>, vector<8x8xf32> -> vector<8x8xf32>
    %48 = arith.addf %47, %16 : vector<8x8xf32>
    %cst_21 = arith.constant dense<0xFF800000> : vector<8xf32>
    %49 = vector.multi_reduction <maximumf>, %48, %cst_21 [1] : vector<8x8xf32> to vector<8xf32>
    %50 = vector.shape_cast %49 : vector<8xf32> to vector<8x1xf32>
    %51 = vector.broadcast %50 : vector<8x1xf32> to vector<8x8xf32>
    %52 = arith.subf %48, %51 : vector<8x8xf32>
    %53 = arith.truncf %52 : vector<8x8xf32> to vector<8x8xbf16>
    %54 = math.exp %53 : vector<8x8xbf16>
    %55 = arith.extf %54 : vector<8x8xbf16> to vector<8x8xf32>
    %cst_22 = arith.constant dense<0.000000e+00> : vector<8xf32>
    %56 = vector.multi_reduction <add>, %55, %cst_22 [1] : vector<8x8xf32> to vector<8xf32>
    %57 = vector.shape_cast %56 : vector<8xf32> to vector<8x1xf32>
    %cst_23 = arith.constant dense<0.000000e+00> : vector<8x8xf32>
    %58 = tpu.matmul %54, %46, %cst_23 {dimension_numbers = #tpu.dot_dimension_numbers<[1], [0], [0], [1], [0, 0, 1, 1], [], []>} : vector<8x8xbf16>, vector<8x8xbf16>, vector<8x8xf32> -> vector<8x8xf32>
    %59 = tpu.reciprocal %57 {approx = true} : vector<8x1xf32> -> vector<8x1xf32>
    %60 = vector.broadcast %59 : vector<8x1xf32> to vector<8x8xf32>
    %61 = arith.mulf %58, %60 : vector<8x8xf32>
    %c0_24 = arith.constant 0 : index
    %c1 = arith.constant 1 : index
    %c0_25 = arith.constant 0 : index
    %c0_26 = arith.constant 0 : index
    %62 = vector.load %arg6[%c0_24, %c1, %c0_25, %c0_26] : memref<1x4x8x8xf32, #tpu.memory_space<vmem>>, vector<1x1x8x8xf32>
    %63 = vector.shape_cast %62 : vector<1x1x8x8xf32> to vector<8x8xf32>
    %64 = vector.shape_cast %61 : vector<8x8xf32> to vector<1x1x8x8xf32>
    tpu.vector_store %arg6[%c0_24, %c1, %c0_25, %c0_26], %64 {strides = array<i32>} : memref<1x4x8x8xf32, #tpu.memory_space<vmem>>, vector<1x1x8x8xf32>,
    %65 = vector.extract_strided_slice %11 {offsets = [0, 16], sizes = [8, 8], strides = [1, 1]} : vector<8x32xf32> to vector<8x8xf32>
    %66 = arith.truncf %65 : vector<8x8xf32> to vector<8x8xbf16>
    %67 = vector.extract_strided_slice %12 {offsets = [0, 16], sizes = [8, 8], strides = [1, 1]} : vector<8x32xf32> to vector<8x8xf32>
    %68 = arith.truncf %67 : vector<8x8xf32> to vector<8x8xbf16>
    %69 = vector.extract_strided_slice %13 {offsets = [0, 16], sizes = [8, 8], strides = [1, 1]} : vector<8x32xf32> to vector<8x8xf32>
    %70 = arith.truncf %69 : vector<8x8xf32> to vector<8x8xbf16>
    %cst_27 = arith.constant dense<0.000000e+00> : vector<8x8xf32>
    %71 = tpu.matmul %66, %68, %cst_27 {dimension_numbers = #tpu.dot_dimension_numbers<[1], [1], [0], [0], [0, 0, 1, 0], [], []>} : vector<8x8xbf16>, vector<8x8xbf16>, vector<8x8xf32> -> vector<8x8xf32>
    %72 = arith.addf %71, %16 : vector<8x8xf32>
    %cst_28 = arith.constant dense<0xFF800000> : vector<8xf32>
    %73 = vector.multi_reduction <maximumf>, %72, %cst_28 [1] : vector<8x8xf32> to vector<8xf32>
    %74 = vector.shape_cast %73 : vector<8xf32> to vector<8x1xf32>
    %75 = vector.broadcast %74 : vector<8x1xf32> to vector<8x8xf32>
    %76 = arith.subf %72, %75 : vector<8x8xf32>
    %77 = arith.truncf %76 : vector<8x8xf32> to vector<8x8xbf16>
    %78 = math.exp %77 : vector<8x8xbf16>
    %79 = arith.extf %78 : vector<8x8xbf16> to vector<8x8xf32>
    %cst_29 = arith.constant dense<0.000000e+00> : vector<8xf32>
    %80 = vector.multi_reduction <add>, %79, %cst_29 [1] : vector<8x8xf32> to vector<8xf32>
    %81 = vector.shape_cast %80 : vector<8xf32> to vector<8x1xf32>
    %cst_30 = arith.constant dense<0.000000e+00> : vector<8x8xf32>
    %82 = tpu.matmul %78, %70, %cst_30 {dimension_numbers = #tpu.dot_dimension_numbers<[1], [0], [0], [1], [0, 0, 1, 1], [], []>} : vector<8x8xbf16>, vector<8x8xbf16>, vector<8x8xf32> -> vector<8x8xf32>
    %83 = tpu.reciprocal %81 {approx = true} : vector<8x1xf32> -> vector<8x1xf32>
    %84 = vector.broadcast %83 : vector<8x1xf32> to vector<8x8xf32>
    %85 = arith.mulf %82, %84 : vector<8x8xf32>
    %c0_31 = arith.constant 0 : index
    %c2 = arith.constant 2 : index
    %c0_32 = arith.constant 0 : index
    %c0_33 = arith.constant 0 : index
    %86 = vector.load %arg6[%c0_31, %c2, %c0_32, %c0_33] : memref<1x4x8x8xf32, #tpu.memory_space<vmem>>, vector<1x1x8x8xf32>
    %87 = vector.shape_cast %86 : vector<1x1x8x8xf32> to vector<8x8xf32>
    %88 = vector.shape_cast %85 : vector<8x8xf32> to vector<1x1x8x8xf32>
    tpu.vector_store %arg6[%c0_31, %c2, %c0_32, %c0_33], %88 {strides = array<i32>} : memref<1x4x8x8xf32, #tpu.memory_space<vmem>>, vector<1x1x8x8xf32>,
    %89 = vector.extract_strided_slice %11 {offsets = [0, 24], sizes = [8, 8], strides = [1, 1]} : vector<8x32xf32> to vector<8x8xf32>
    %90 = arith.truncf %89 : vector<8x8xf32> to vector<8x8xbf16>
    %91 = vector.extract_strided_slice %12 {offsets = [0, 24], sizes = [8, 8], strides = [1, 1]} : vector<8x32xf32> to vector<8x8xf32>
    %92 = arith.truncf %91 : vector<8x8xf32> to vector<8x8xbf16>
    %93 = vector.extract_strided_slice %13 {offsets = [0, 24], sizes = [8, 8], strides = [1, 1]} : vector<8x32xf32> to vector<8x8xf32>
    %94 = arith.truncf %93 : vector<8x8xf32> to vector<8x8xbf16>
    %cst_34 = arith.constant dense<0.000000e+00> : vector<8x8xf32>
    %95 = tpu.matmul %90, %92, %cst_34 {dimension_numbers = #tpu.dot_dimension_numbers<[1], [1], [0], [0], [0, 0, 1, 0], [], []>} : vector<8x8xbf16>, vector<8x8xbf16>, vector<8x8xf32> -> vector<8x8xf32>
    %96 = arith.addf %95, %16 : vector<8x8xf32>
    %cst_35 = arith.constant dense<0xFF800000> : vector<8xf32>
    %97 = vector.multi_reduction <maximumf>, %96, %cst_35 [1] : vector<8x8xf32> to vector<8xf32>
    %98 = vector.shape_cast %97 : vector<8xf32> to vector<8x1xf32>
    %99 = vector.broadcast %98 : vector<8x1xf32> to vector<8x8xf32>
    %100 = arith.subf %96, %99 : vector<8x8xf32>
    %101 = arith.truncf %100 : vector<8x8xf32> to vector<8x8xbf16>
    %102 = math.exp %101 : vector<8x8xbf16>
    %103 = arith.extf %102 : vector<8x8xbf16> to vector<8x8xf32>
    %cst_36 = arith.constant dense<0.000000e+00> : vector<8xf32>
    %104 = vector.multi_reduction <add>, %103, %cst_36 [1] : vector<8x8xf32> to vector<8xf32>
    %105 = vector.shape_cast %104 : vector<8xf32> to vector<8x1xf32>
    %cst_37 = arith.constant dense<0.000000e+00> : vector<8x8xf32>
    %106 = tpu.matmul %102, %94, %cst_37 {dimension_numbers = #tpu.dot_dimension_numbers<[1], [0], [0], [1], [0, 0, 1, 1], [], []>} : vector<8x8xbf16>, vector<8x8xbf16>, vector<8x8xf32> -> vector<8x8xf32>
    %107 = tpu.reciprocal %105 {approx = true} : vector<8x1xf32> -> vector<8x1xf32>
    %108 = vector.broadcast %107 : vector<8x1xf32> to vector<8x8xf32>
    %109 = arith.mulf %106, %108 : vector<8x8xf32>
    %c0_38 = arith.constant 0 : index
    %c3 = arith.constant 3 : index
    %c0_39 = arith.constant 0 : index
    %c0_40 = arith.constant 0 : index
    %110 = vector.load %arg6[%c0_38, %c3, %c0_39, %c0_40] : memref<1x4x8x8xf32, #tpu.memory_space<vmem>>, vector<1x1x8x8xf32>
    %111 = vector.shape_cast %110 : vector<1x1x8x8xf32> to vector<8x8xf32>
    %112 = vector.shape_cast %109 : vector<8x8xf32> to vector<1x1x8x8xf32>
    tpu.vector_store %arg6[%c0_38, %c3, %c0_39, %c0_40], %112 {strides = array<i32>} : memref<1x4x8x8xf32, #tpu.memory_space<vmem>>, vector<1x1x8x8xf32>,
    return
  }
  func.func @transform_0(%arg0: i32, %arg1: i32) -> (i32, i32, i32) {
    %c0_i32 = arith.constant 0 : i32
    %c0_i32_0 = arith.constant 0 : i32
    %c0_i32_1 = arith.constant 0 : i32
    return %arg1, %c0_i32, %c0_i32_0 : i32, i32, i32
  }
  func.func @transform_1(%arg0: i32, %arg1: i32) -> (i32, i32, i32) {
    %c0_i32 = arith.constant 0 : i32
    %c0_i32_0 = arith.constant 0 : i32
    %c0_i32_1 = arith.constant 0 : i32
    return %arg0, %c0_i32, %c0_i32_0 : i32, i32, i32
  }
  func.func @transform_2(%arg0: i32, %arg1: i32) -> (i32, i32, i32) {
    %c0_i32 = arith.constant 0 : i32
    %c0_i32_0 = arith.constant 0 : i32
    %c0_i32_1 = arith.constant 0 : i32
    return %arg0, %c0_i32, %c0_i32_0 : i32, i32, i32
  }
  func.func @transform_3(%arg0: i32, %arg1: i32) -> (i32, i32, i32) {
    %c0_i32 = arith.constant 0 : i32
    %c0_i32_0 = arith.constant 0 : i32
    %c0_i32_1 = arith.constant 0 : i32
    %c0_i32_2 = arith.constant 0 : i32
    return %c0_i32, %c0_i32_0, %c0_i32_1 : i32, i32, i32
  }
  func.func @transform_4(%arg0: i32, %arg1: i32) -> (i32, i32, i32, i32) {
    %c0_i32 = arith.constant 0 : i32
    %c0_i32_0 = arith.constant 0 : i32
    %c0_i32_1 = arith.constant 0 : i32
    return %arg1, %arg0, %c0_i32, %c0_i32_0 : i32, i32, i32, i32
  }
}

</mosaic_0001>

<bundles_post_ra>
// kernel: tpu_custom_call.1
= control target key start
LH: loop header
LB: loop body
LE: loop exit
PB: predicated region body
PF: predicated region fallthrough
CT: control target
= control target key end

     0   :  { %s1575_s0 = inlined_call_operand.hbm [shape: bf16[2,8,32], index: 0, kind: input, shape index: {}]   ;;  %s1576_s1 = inlined_call_operand.hbm [shape: bf16[1,32,96], index: 1, kind: input, shape index: {}]   ;;  %s1577_s2 = inlined_call_operand.vmem [shape: f32[1,1,96], index: 2, kind: input, shape index: {}]   ;;  %s1578_s3 = inlined_call_operand.vmem [shape: bf16[1,8,8], index: 3, kind: input, shape index: {}]   ;;  %s1579_s4 = inlined_call_operand.hbm [shape: f32[2,4,8,8], index: 4, kind: output, shape index: {}]  }
   0x1   :  { %1581 = sst [smem:[#allocation11_spill]] %s1576_s1 }
   0x2   :  { %9 = vsyncpa [#allocation3], 0 }
   0x3   :  { %11 = vsyncpa [#allocation3 + $0x1], 0 }
   0x4   :  { %12 = vsyncpa [#allocation6], 0 }
   0x5   :  { %13 = vsyncpa [#allocation4], 0 }
   0x6   :  { %15 = vsyncpa [#allocation4 + $0x1], 0  ;;  %s1321_s15 = smov 0   ;;  %s1323_s16 = smov 0  }
   0x7   :  { %s1325_s17 = smov 0   ;;  %s1327_s18 = smov 0  }
   0x8   :  { %s1329_s19 = smov 0   ;;  %s1331_s20 = smov 0  }
   0x9 LB: > { %s920_s21 = sadd.s32 4294967295, %s1274_s20   ;;  %s921_s22 = sadd.s32 4294967294, %s1274_s20   ;;  %s1274_s20 = sphi %s1331_s20, %s21_s20   ;;  %s1270_s19 = sphi %s1329_s19, %s1599_s19   ;;  %s1266_s18 = sphi %s1327_s18, %s1598_s18   ;;  %s1262_s17 = sphi %s1325_s17, %s1597_s17   ;;  %s1258_s16 = sphi %s1323_s16, %s1596_s16   ;;  %s1254_s15 = sphi %s1321_s15, %s1595_s15  }
   0xa   : > { %p53_p0 = scmp.ne.s32.totalorder %s1258_s16, %s1254_s15  ;;  %p1355_p1 = scmp.eq.s32.totalorder %s920_s21, 0 }
   0xb   : > { %p1359_p2 = scmp.eq.s32.totalorder %s920_s21, 1  ;;  %p158_p3 = scmp.eq.s32.totalorder %s921_s22, 1 }
   0xc   : > { %p1365_p4 = por %p1355_p1, %p53_p0  ;;  %p922_p5 = scmp.ge.s32.totalorder %s1274_s20, 1 }
   0xd   : > { %p1370_p6 = por %p158_p3, %p53_p0  ;;  %p165_p7 = scmp.lt.s32.totalorder %s1274_s20, 3 }
   0xe   : > { %s1584_s25 = scalar_select %p1365_p4, 1, 0 }
   0xf   : > { %s1585_s26 = scalar_select %p1370_p6, 1, 0 }
  0x10   : > { %p1375_p8 = pnand %p922_p5, %p165_p7  ;;  %s1276_s28 = smov [#allocation5]  }
  0x11   : > { %s180_s29 = sshll.u32 %s1276_s28, 4  ;;  %s30_s5 = sadd.s32 1, %s1270_s19  ;;  %s181_s29 = int_to_ptr.vmem [resolvable:$true] %s180_s29 }
  0x12   : > { %p1036_p9 = pneg %p1375_p8  ;;  %s1147_s6 = scalar_lea.vmem %s181_s29, 256 }
  0x13   : > { %p1148_p13 = scmp.ne.s32.totalorder %s181_s29, %s1147_s6  ;;  %p1155_p5 = scmp.lt.s32.totalorder %s181_s29, %s181_s29 }
  0x14   : > { %p1384_p11 = pnand %p1036_p9, %p1355_p1  ;;  %p1156_p7 = scmp.lt.s32.totalorder %s1147_s6, %s1147_s6 }
  0x16   : > { %p1138_p12 = pneg %p1384_p11  ;;  %p1157_p6 = por %p1156_p7, %p1155_p5 }
  0x18   : > { %p1150_p0 = pnand %p1148_p13, %p1138_p12 }
  0x1a   : > { %p1151_p3 = pneg %p1150_p0 }
  0x1c   : > { %p1158_p4 = pnand %p1157_p6, %p1151_p3 }
  0x1e   : > { %1161 = shalt.err (!%p1158_p4)
}
  0x1f   : > { %s1277_s7 = smov 64   ;;  %s1278_s8 = smov 4  }
  0x20   : > { %s1588_s1 = sld [smem:[#allocation11_spill]]  ;;  %p31_p6 = scmp.ge.s32.totalorder %s30_s5, 2 }
  0x21   : > { %s40_s11 = sadd.s32 1, %s1262_s17  ;;  %p47_p4 = scmp.ne.s32.totalorder %s1262_s17, %s1258_s16 }
  0x22   : > { %p48_p9 = scmp.eq.s32.totalorder %s1274_s20, 0  ;;  %s1601_s5 = smov (%p31_p6, %s30_s5), 0 }
  0x23   : > { %p1408_p13 = por %p1359_p2, %p47_p4  ;;  %s37_s14 = ssub.s32 %s1270_s19, %s1601_s5 }
  0x24   : > { %p1402_p12 = por %p48_p9, %p47_p4  ;;  %p1049_p0 = scmp.lt.s32.totalorder %s1274_s20, 2 }
  0x25   : > { %s203_s21 = sand.u32 1, %s1262_s17  }
  0x26   : > { %1039 = dma.hbm_to_vmem [thread:$0]  (!%p1384_p11), %s1588_s1, 256, %s181_s29, [#allocation6], %s1277_s7, %s1277_s7, %s1278_s8  }
  0x27   : > { %p38_p11 = scmp.eq.s32.totalorder %s37_s14, 0  ;;  %s926_s22 = sshll.u32 %s203_s21, 2 }
  0x28   : > { %s927_s29 = sshll.u32 %s1270_s19, 6  ;;  %s207_s8 = scalar_lea.vmem [#allocation2], %s926_s22 }
  0x29   : > { %s1417_s28 = scalar_select %p38_p11, %s1262_s17, %s40_s11  }
  0x2a   : > { %s212_s7 = scalar_lea.hbm %s1575_s0, %s927_s29  ;;  %s214_s9 = sshll.u32 %s207_s8, 4  ;;  %s215_s9 = int_to_ptr.vmem [resolvable:$true] %s214_s9 }
  0x2b   : > { %p1425_p2 = pnand %p1049_p0, %p1402_p12  ;;  %s204_s10 = scalar_lea.sflag [#allocation3], %s203_s21 }
  0x2c   : > { %s1175_s14 = scalar_lea.vmem %s215_s9, 64  ;;  %s1279_s11 = smov [#allocation2]  }
  0x2d   : > { %p1164_p3 = pneg %p1425_p2  ;;  %p1176_p5 = scmp.ne.s32.totalorder %s215_s9, %s1175_s14 }
  0x2e   : > { %s1180_s1 = sshll.u32 %s1279_s11, 4  ;;  %s1181_s1 = int_to_ptr.vmem [resolvable:$false] %s1180_s1 }
  0x2f   : > { %p1178_p7 = pnand %p1176_p5, %p1164_p3  ;;  %s1182_s29 = scalar_lea.vmem %s1181_s1, 128 }
  0x30   : > { %p1183_p4 = scmp.lt.s32.totalorder %s215_s9, %s1181_s1  ;;  %p1184_p9 = scmp.lt.s32.totalorder %s1182_s29, %s1175_s14 }
  0x31   : > { %p1179_p6 = pneg %p1178_p7 }
  0x32   : > { %p1185_p11 = por %p1184_p9, %p1183_p4 }
  0x34   : > { %p1186_p10 = pnand %p1185_p11, %p1179_p6 }
  0x36   : > { %1189 = shalt.err (!%p1186_p10)
}
  0x37   : > { %1043 = dma.hbm_to_vmem [thread:$0]  (!%p1425_p2), %s212_s7, 64, %s215_s9, %s204_s10  }
  0x38   : > { %223 = sbr.rel (%p1375_p8) target bundleno = 1012 (0x3f4), region = 36  ;;  %s1436_s12 = sand.u32 (!%p1375_p8), 1, %s1258_s16  }
  0x39   : > { %s929_s21 = sshll.u32 (!%p1375_p8), %s1436_s12, 2  ;;  %s226_s22 = scalar_lea.sflag (!%p1375_p8), [#allocation3], %s1436_s12 }
  0x3a   : > { %s229_s30 = scalar_lea.vmem (!%p1375_p8), [#allocation2], %s929_s21  ;;  %p1592_p12 = scmp.ne.s32.totalorder (!%p1375_p8), %s1584_s25, 0 }
  0x3d   : > { %1241 = dma.done.wait (%p1592_p12), %s226_s22, 64  }
  0x3e   : > { %1243 = vsyncadd (%p1592_p12), %s226_s22, 4294967232 }
  0x3f   : > { %1245 = dma.done.wait (%p1355_p1), [#allocation6], 256  }
  0x40   : > { %1247 = vsyncadd (%p1355_p1), [#allocation6], 4294967040  ;;  %v1280_v0 = vmov 0.0   ;;  %vm1281_vm0 = vmmov 0   ;;  %v1118_v1 = vld [vmem:[#allocation5 + $0x8] sm:$0xff]   ;;  %v1119_v2 = vld [vmem:[#allocation5] sm:$0xff]  }
  0x41   : > { %972 = vmatprep.subr.bf16.mxu0 %v1280_v0  ;;  %976 = vmatprep.mubr.msk.bf16.mxu0 %vm1281_vm0, %v1280_v0  ;;  %v266_v3 = vld [vmem:[%s229_s30] sm:$0xf]  ;;  %vm290_vm1 = vcmask 261120   ;;  %s1282_s25 = smov 96   ;;  %s1283_s27 = smov 120   ;;  %vm342_vm2 = vcmask 64512  }
  0x42   : > { %980 = vmatprep.subr.bf16.mxu1 %v1280_v0  ;;  %982 = vmatprep.mubr.msk.bf16.mxu1 %vm1281_vm0, %v1280_v0  ;;  %v932_v4 = vld [vmem:[%s1577_s2] ss:$0 sm:$0xff]  ;;  %s1284_s6 = smov 88   ;;  %s1285_s7 = smov 80   ;;  %vm406_vm3 = vcmask 1043456  }
  0x43   : > { %973 = vmatpush3.bf16.msra.mxu0 %v1118_v1  ;;  %s1286_s8 = smov 112   ;;  %s1287_s9 = smov 72   ;;  %v335_v24 = vld [vmem:[%s1578_s3] sm:$0xf] }
  0x44   : > { %974 = vmatprep.subr.bf16.mxu0 %v1280_v0  ;;  %s1288_s24 = smov 104   ;;  %v336_v25 = vunpack.c.l.bf16 %v335_v24  ;;  %s1289_s11 = smov 56  }
  0x45   : > { %s1290_s29 = smov 64   ;;  %s1291_s21 = smov 40  }
  0x46   : > { %s1292_s22 = smov 48   ;;  %s931_s30 = sshll.u32 %s1436_s12, 5 }
  0x47   : > { %975 = vmatpush3.bf16.msra.mxu0 %v1119_v2  ;;  %s260_s1 = scalar_lea.vmem [#allocation7], %s931_s30 }
  0x48   : > { %986 = vmatprep.subr.bf16.mxu0 %v1280_v0  ;;  %s812_s23 = sshll.u32 %s260_s1, 4  ;;  %s1521_s23 = int_to_ptr.vmem [resolvable:$true] %s812_s23 }
  0x4a   : > { %977 = vmatmul.mubr.msk.bf16.vlgmr.msra.gmra.mxu0 %vm290_vm1, %v266_v3 }
  0x4b   : > { %988 = vmatprep.mubr.msk.bf16.mxu0 %vm1281_vm0, %v1280_v0 }
 0x10a   : > { %v328_v5 = vpop.f32.mrf.mxu0 }
 0x10b   : > { %v329_v6 = vadd.f32 %v932_v4, %v328_v5 }
 0x10c   : > { %v978_v7 = vpop.f32.mrf.mxu0 }
 0x10d   : > { %v334_v8 = vmul.f32 0.35355338, %v329_v6  ;;  %v1461_v9 = vpack.c.bf16 %v329_v6, %v329_v6 }
 0x10e   : > { %v331_v10 = vpop.f32.mrf.mxu0 }
 0x10f   : > { %v337_v11 = vpack.c.bf16 %v334_v8, %v334_v8  ;;  %340 = vrot.lane.b32.xlu0 %v1461_v9, %s1282_s25  ;;  %s952_s25 = sshll.u32 %s1266_s18, 9  ;;  %s1293_s18 = smov [#allocation7]  }
 0x110   : > { %v979_v12 = vpop.f32.mrf.mxu0 }
 0x111   : > { %454 = vrot.lane.b32.xlu1 %v337_v11, %s1283_s27 }
 0x113   : > { %456 = vrot.lane.b32.xlu0 %v1461_v9, %s1284_s6 }
 0x115   : > { %570 = vrot.lane.b32.xlu1 %v1461_v9, %s1285_s7  ;;  %s1526_s7 = scalar_lea.hbm %s1579_s4, %s952_s25 }
 0x117   : > { %568 = vrot.lane.b32.xlu0 %v337_v11, %s1286_s8  ;;  %s797_s8 = scalar_lea.sflag [#allocation4], %s1436_s12 }
 0x119   : > { %684 = vrot.lane.b32.xlu1 %v1461_v9, %s1287_s9  ;;  %s1190_s9 = scalar_lea.vmem %s1521_s23, 512 }
 0x11a   : > { %p1191_p1 = scmp.ne.s32.totalorder %s1521_s23, %s1190_s9 }
 0x11b   : > { %682 = vrot.lane.b32.xlu0 %v337_v11, %s1288_s24  ;;  %s1194_s24 = sshll.u32 %s1293_s18, 4  ;;  %s1195_s24 = int_to_ptr.vmem [resolvable:$false] %s1194_s24 }
 0x11c   : > { %p1192_p8 = pnand %p1191_p1, %p1408_p13  ;;  %s1196_s10 = scalar_lea.vmem %s1195_s24, 1024 }
 0x11d   : > { %p1197_p0 = scmp.lt.s32.totalorder %s1521_s23, %s1195_s24  ;;  %p1198_p2 = scmp.lt.s32.totalorder %s1196_s10, %s1190_s9 }
 0x11e   : > { %p1193_p10 = pneg %p1192_p8 }
 0x11f   : > { %p1199_p3 = por %p1198_p2, %p1197_p0 }
 0x121   : > { %p1200_p5 = pnand %p1199_p3, %p1193_p10 }
 0x181   : > { %v341_v13 = vpop.permute.xlu0 %340 }
 0x182   : > { %v347_v14 = vsel %vm342_vm2, %v341_v13, 0 }
 0x183   : > { %981 = vmatpush3.bf16.xpose.msra.mxu1 %v347_v14  ;;  %v455_v16 = vpop.permute.xlu1 %454 }
 0x184   : > { %992 = vmatprep.subr.bf16.mxu1 %v1280_v0 }
 0x185   : > { %v457_v15 = vpop.permute.xlu0 %456 }
 0x186   : > { %v462_v17 = vsel %vm342_vm2, %v457_v15, 0 }
 0x187   : > { %v571_v18 = vpop.permute.xlu1 %570 }
 0x188   : > { %v576_v19 = vsel %vm342_vm2, %v571_v18, 0 }
 0x189   : > { %v569_v21 = vpop.permute.xlu0 %568 }
 0x18a   : > { %983 = vmatmul.mubr.msk.bf16.vlgmr.msra.gmra.mxu1 %vm342_vm2, %v337_v11 }
 0x18b   : > { %993 = vmatpush3.bf16.xpose.msra.mxu1 %v462_v17  ;;  %994 = vmatprep.mubr.msk.bf16.mxu1 %vm1281_vm0, %v1280_v0  ;;  %v685_v20 = vpop.permute.xlu1 %684 }
 0x18c   : > { %1004 = vmatprep.subr.bf16.mxu1 %v1280_v0  ;;  %v690_v22 = vsel %vm342_vm2, %v685_v20, 0 }
 0x18d   : > { %v683_v23 = vpop.permute.xlu0 %682 }
 0x192   : > { %995 = vmatmul.mubr.msk.bf16.vlgmr.msra.gmra.mxu1 %vm342_vm2, %v455_v16 }
 0x193   : > { %1005 = vmatpush3.bf16.xpose.msra.mxu1 %v576_v19  ;;  %1006 = vmatprep.mubr.msk.bf16.mxu1 %vm1281_vm0, %v1280_v0 }
 0x194   : > { %1016 = vmatprep.subr.bf16.mxu1 %v1280_v0 }
 0x19a   : > { %1007 = vmatmul.mubr.msk.bf16.vlgmr.msra.gmra.mxu1 %vm342_vm2, %v569_v21 }
 0x19b   : > { %1017 = vmatpush3.bf16.xpose.msra.mxu1 %v690_v22  ;;  %1018 = vmatprep.mubr.msk.bf16.mxu1 %vm1281_vm0, %v1280_v0 }
 0x1a2   : > { %1019 = vmatmul.mubr.msk.bf16.vlgmr.msra.gmra.mxu1 %vm342_vm2, %v683_v23 }
 0x24a   : > { %v383_v26 = vpop.f32.mrf.mxu1 }
 0x24b   : > { %v384_v27 = vadd.f32 %v383_v26, %v336_v25 }
 0x24c   : > { %v984_v28 = vpop.f32.mrf.mxu1 }
 0x24d   : > { %v389_v29 = vsel %vm342_vm2, %v384_v27, -inf }
 0x24e   : > { %390 = vmax.xlane.f32.xlu1 %v389_v29  ;;  %v386_v30 = vpop.f32.mrf.mxu1 }
 0x250   : > { %v985_v31 = vpop.f32.mrf.mxu1 }
 0x252   : > { %v498_v32 = vpop.f32.mrf.mxu1 }
 0x253   : > { %v499_v33 = vadd.f32 %v498_v32, %v336_v25 }
 0x254   : > { %v996_v34 = vpop.f32.mrf.mxu1 }
 0x255   : > { %v504_v35 = vsel %vm342_vm2, %v499_v33, -inf }
 0x256   : > { %505 = vmax.xlane.f32.xlu0 %v504_v35  ;;  %v501_v36 = vpop.f32.mrf.mxu1 }
 0x258   : > { %v997_v37 = vpop.f32.mrf.mxu1 }
 0x25a   : > { %v612_v38 = vpop.f32.mrf.mxu1 }
 0x25b   : > { %v613_v39 = vadd.f32 %v612_v38, %v336_v25 }
 0x25c   : > { %v1008_v40 = vpop.f32.mrf.mxu1 }
 0x25d   : > { %v618_v41 = vsel %vm342_vm2, %v613_v39, -inf }
 0x25e   : > { %619 = vmax.xlane.f32.xlu0 %v618_v41  ;;  %v615_v42 = vpop.f32.mrf.mxu1 }
 0x25f   : > { %516 = vrot.lane.b32.xlu1 %v1461_v9, %s1289_s11 }
 0x260   : > { %v1009_v43 = vpop.f32.mrf.mxu1 }
 0x262   : > { %v726_v44 = vpop.f32.mrf.mxu1 }
 0x263   : > { %v727_v48 = vadd.f32 %v726_v44, %v336_v25 }
 0x264   : > { %v1020_v45 = vpop.f32.mrf.mxu1 }
 0x265   : > { %v732_v49 = vsel %vm342_vm2, %v727_v48, -inf }
 0x266   : > { %v729_v46 = vpop.f32.mrf.mxu1 }
 0x268   : > { %v1021_v47 = vpop.f32.mrf.mxu1 }
 0x274   : > { %401 = vrot.lane.b32.xlu0 %v1461_v9, %s1290_s29 }
 0x278   : > { %744 = vrot.lane.b32.xlu0 %v1461_v9, %s1291_s21 }
 0x283   : > { %733 = vmax.xlane.f32.xlu1 %v732_v49 }
 0x294   : > { %630 = vrot.lane.b32.xlu1 %v1461_v9, %s1292_s22 }
 0x2d7   : > { %v391_v50 = vpop.xlane.xlu1 %390 }
 0x2d8   : > { %v392_v51 = vsub.f32 %v384_v27, %v391_v50 }
 0x2da   : > { %v393_v52 = vpack.c.bf16 %v392_v51, %v392_v51 }
 0x2db   : > { %v517_v2 = vpop.permute.xlu1 %516 }
 0x2dc   : > { %v395_v53 = vmul.bf16 1069105081, %v393_v52  ;;  %v522_v5 = vsel %vm406_vm3, %v517_v2, 0 }
 0x2de   : > { %1120 = vpow.bf16 %v395_v53 }
 0x2df   : > { %v506_v54 = vpop.xlane.xlu0 %505 }
 0x2e0   : > { %v507_v55 = vsub.f32 %v499_v33, %v506_v54 }
 0x2e2   : > { %v508_v56 = vpack.c.bf16 %v507_v55, %v507_v55 }
 0x2e4   : > { %v510_v57 = vmul.bf16 1069105081, %v508_v56 }
 0x2e6   : > { %1122 = vpow.bf16 %v510_v57 }
 0x2e7   : > { %v620_v58 = vpop.xlane.xlu0 %619 }
 0x2e8   : > { %v621_v59 = vsub.f32 %v613_v39, %v620_v58 }
 0x2ea   : > { %v622_v60 = vpack.c.bf16 %v621_v59, %v621_v59 }
 0x2eb   : > { %v402_v61 = vpop.permute.xlu0 %401 }
 0x2ec   : > { %v1121_v62 = vpop.eup %1120  ;;  %v624_v63 = vmul.bf16 1069105081, %v622_v60  ;;  %v408_v1 = vsel %vm406_vm3, %v402_v61, 0 }
 0x2ed   : > { %987 = vmatpush3.bf16.msra.mxu0 %v408_v1  ;;  %v397_v3 = vunpack.c.l.bf16 %v1121_v62 }
 0x2ee   : > { %1124 = vpow.bf16 %v624_v63  ;;  %998 = vmatprep.subr.bf16.mxu0 %v1280_v0 }
 0x2ef   : > { %v398_v4 = vsel %vm342_vm2, %v397_v3, 0.0  ;;  %v745_v18 = vpop.permute.xlu0 %744 }
 0x2f0   : > { %989 = vmatmul.mubr.msk.bf16.vlgmr.msra.gmra.mxu0 %vm342_vm2, %v1121_v62  ;;  %399 = vadd.xlane.f32.xlu1 %v398_v4  ;;  %v750_v19 = vsel %vm406_vm3, %v745_v18, 0 }
 0x2f1   : > { %999 = vmatpush3.bf16.msra.mxu0 %v522_v5  ;;  %1000 = vmatprep.mubr.msk.bf16.mxu0 %vm1281_vm0, %v1280_v0 }
 0x2f2   : > { %1010 = vmatprep.subr.bf16.mxu0 %v1280_v0 }
 0x2f4   : > { %v1123_v6 = vpop.eup %1122 }
 0x2f5   : > { %v512_v7 = vunpack.c.l.bf16 %v1123_v6 }
 0x2f7   : > { %v513_v8 = vsel %vm342_vm2, %v512_v7, 0.0 }
 0x2f8   : > { %514 = vadd.xlane.f32.xlu0 %v513_v8  ;;  %1001 = vmatmul.mubr.msk.bf16.vlgmr.msra.gmra.mxu0 %vm342_vm2, %v1123_v6 }
 0x2f9   : > { %1012 = vmatprep.mubr.msk.bf16.mxu0 %vm1281_vm0, %v1280_v0 }
 0x2fc   : > { %v1125_v9 = vpop.eup %1124 }
 0x2fd   : > { %v626_v10 = vunpack.c.l.bf16 %v1125_v9 }
 0x2ff   : > { %v627_v11 = vsel %vm342_vm2, %v626_v10, 0.0 }
 0x300   : > { %628 = vadd.xlane.f32.xlu0 %v627_v11 }
 0x30c   : > { %v734_v12 = vpop.xlane.xlu1 %733 }
 0x30d   : > { %v735_v13 = vsub.f32 %v727_v48, %v734_v12 }
 0x30f   : > { %v736_v14 = vpack.c.bf16 %v735_v13, %v735_v13 }
 0x310   : > { %v631_v15 = vpop.permute.xlu1 %630 }
 0x311   : > { %v738_v16 = vmul.bf16 1069105081, %v736_v14  ;;  %v636_v17 = vsel %vm406_vm3, %v631_v15, 0 }
 0x312   : > { %1011 = vmatpush3.bf16.msra.mxu0 %v636_v17 }
 0x313   : > { %1126 = vpow.bf16 %v738_v16  ;;  %1022 = vmatprep.subr.bf16.mxu0 %v1280_v0 }
 0x315   : > { %1013 = vmatmul.mubr.msk.bf16.vlgmr.msra.gmra.mxu0 %vm342_vm2, %v1125_v9 }
 0x316   : > { %1023 = vmatpush3.bf16.msra.mxu0 %v750_v19  ;;  %1024 = vmatprep.mubr.msk.bf16.mxu0 %vm1281_vm0, %v1280_v0 }
 0x321   : > { %v1127_v20 = vpop.eup %1126 }
 0x322   : > { %1025 = vmatmul.mubr.msk.bf16.vlgmr.msra.gmra.mxu0 %vm342_vm2, %v1127_v20  ;;  %v740_v21 = vunpack.c.l.bf16 %v1127_v20 }
 0x324   : > { %v741_v22 = vsel %vm342_vm2, %v740_v21, 0.0 }
 0x325   : > { %742 = vadd.xlane.f32.xlu1 %v741_v22 }
 0x379   : > { %v400_v23 = vpop.xlane.xlu1 %399 }
 0x37a   : > { %1128 = vrcp.f32 %v400_v23 }
 0x381   : > { %v515_v24 = vpop.xlane.xlu0 %514 }
 0x382   : > { %1130 = vrcp.f32 %v515_v24 }
 0x387   : > { %v1129_v25 = vpop.eup %1128 }
 0x389   : > { %v629_v36 = vpop.xlane.xlu0 %628 }
 0x38a   : > { %1132 = vrcp.f32 %v629_v36 }
 0x38f   : > { %v1131_v30 = vpop.eup %1130 }
 0x397   : > { %v1133_v38 = vpop.eup %1132 }
 0x3ae   : > { %v743_v37 = vpop.xlane.xlu1 %742 }
 0x3af   : > { %1134 = vrcp.f32 %v743_v37 }
 0x3b0   : > { %v444_v26 = vpop.f32.mrf.mxu0 }
 0x3b1   : > { %v451_v27 = vmul.f32 %v1129_v25, %v444_v26 }
 0x3b2   : > { %v990_v28 = vpop.f32.mrf.mxu0 }
 0x3b3   : > { %452 = vst.msk [vmem:[%s260_s1] sm:$0xff] %vm342_vm2, %v451_v27 }
 0x3b4   : > { %v447_v0 = vpop.f32.mrf.mxu0 }
 0x3b6   : > { %v991_v29 = vpop.f32.mrf.mxu0 }
 0x3b8   : > { %v558_v31 = vpop.f32.mrf.mxu0 }
 0x3b9   : > { %v565_v32 = vmul.f32 %v1131_v30, %v558_v31 }
 0x3ba   : > { %v1002_v33 = vpop.f32.mrf.mxu0 }
 0x3bb   : > { %940 = vst.msk [vmem:[%s260_s1 + $0x8] sm:$0xff] %vm342_vm2, %v565_v32 }
 0x3bc   : > { %v561_v34 = vpop.f32.mrf.mxu0  ;;  %v1135_v44 = vpop.eup %1134 }
 0x3be   : > { %v1003_v35 = vpop.f32.mrf.mxu0 }
 0x3d5   : > { %v672_v39 = vpop.f32.mrf.mxu0 }
 0x3d6   : > { %v679_v40 = vmul.f32 %v1133_v38, %v672_v39 }
 0x3d7   : > { %v1014_v41 = vpop.f32.mrf.mxu0 }
 0x3d8   : > { %943 = vst.msk [vmem:[%s260_s1 + $0x10] sm:$0xff] %vm342_vm2, %v679_v40 }
 0x3d9   : > { %v675_v42 = vpop.f32.mrf.mxu0 }
 0x3db   : > { %v1015_v43 = vpop.f32.mrf.mxu0 }
 0x3e2   : > { %v786_v45 = vpop.f32.mrf.mxu0 }
 0x3e3   : > { %v793_v46 = vmul.f32 %v1135_v44, %v786_v45 }
 0x3e4   : > { %v1026_v47 = vpop.f32.mrf.mxu0 }
 0x3e5   : > { %946 = vst.msk [vmem:[%s260_s1 + $0x18] sm:$0xff] %vm342_vm2, %v793_v46 }
 0x3e6   : > { %v789_v48 = vpop.f32.mrf.mxu0 }
 0x3e7   : > { %1203 = shalt.err (!%p1200_p5)
}
 0x3e8   : > { %s1204_s14 = scalar_lea.hbm %s1526_s7, 512  ;;  %s1208_s21 = scalar_lea.hbm %s1579_s4, 1024 }
 0x3e9   : > { %p1205_p7 = scmp.ne.s32.totalorder %s1526_s7, %s1204_s14  ;;  %p1209_p9 = scmp.lt.s32.totalorder %s1526_s7, %s1579_s4 }
 0x3ea   : > { %p1210_p11 = scmp.lt.s32.totalorder %s1208_s21, %s1204_s14 }
 0x3eb   : > { %p1206_p6 = pnand %p1205_p7, %p1408_p13 }
 0x3ec   : > { %p1211_p12 = por %p1210_p11, %p1209_p9 }
 0x3ed   : > { %p1207_p4 = pneg %p1206_p6 }
 0x3ef   : > { %p1212_p1 = pnand %p1211_p12, %p1207_p4 }
 0x3f1   : > { %1215 = shalt.err (!%p1212_p1)
}
 0x3f2   : > { %s1294_s1 = smov 128   ;;  %s1295_s25 = smov 8   ;;  %v1027_v49 = vpop.f32.mrf.mxu0 }
 0x3f3   : > { %1034 = dma.vmem_to_hbm [thread:$0]  (%p1408_p13), %s1521_s23, 512, %s1526_s7, %s797_s8, %s1294_s1, %s1294_s1, %s1295_s25  }
 0x3f4 PF: > { %s827_s27 = sand.u32 1, %s1254_s15   ;;  %p1593_p8 = scmp.ne.s32.totalorder %s1585_s26, 0 }
 0x3f5   : > { %p1594_p10 = scmp.ge.s32.totalorder %s1274_s20, 2  ;;  %s828_s6 = scalar_lea.sflag [#allocation4], %s827_s27 }
 0x3f7   : > { %p1045_p0 = pnand %p1594_p10, %p1593_p8 }
 0x3f9   : > { %p1046_p2 = pneg %p1045_p0 }
 0x3fb   : > { %1249 = dma.done.wait (%p1046_p2), %s828_s6, 512  }
 0x3fc   : > { %1251 = vsyncadd (%p1046_p2), %s828_s6, 4294966784  ;;  %s21_s20 = sadd.s32 1, %s1274_s20   ;;  %s1595_s15 = smov %s1258_s16 }
 0x3fd   : > { %p18_p3 = scmp.ge.s32.totalorder %s21_s20, 4   ;;  %s1596_s16 = smov %s1262_s17 }
 0x3fe   : > { %s1597_s17 = smov %s1417_s28  ;;  %s1598_s18 = smov %s1270_s19 }
 0x3ff   : > { %s1599_s19 = smov %s1601_s5  ;;  %20 = sbr.rel (!%p18_p3) target bundleno = 9 (0x9), region = 92 }
 0x404   :  { %833 = vsyncpa [#allocation3], 1 }
 0x405   :  { %835 = vsyncpa [#allocation3 + $0x1], 1 }
 0x406   :  { %836 = vsyncpa [#allocation6], 1 }
 0x407   :  { %837 = vsyncpa [#allocation4], 1 }
 0x408   :  { %839 = vsyncpa [#allocation4 + $0x1], 1 }

</bundles_post_ra>
